<compile_context>
chip_gen: v7x
topology: tpu7x:2x2x1
jax: 0.10.0
libtpu: 0.0.40
codegen_flags: <defaults>
</compile_context>

<pallas_src>
import functools

import jax
import jax.numpy as jnp
from jax import lax
from jax.experimental import pallas as pl
from jax.experimental.pallas import tpu as pltpu

KSIZE = 3
PAD = 1
EPS = 1e-5


def _num_tensorcores():
    """2 for v7x-class chips (2 TCs/chip), else 1.  Purely a perf knob."""
    try:
        kind = jax.devices()[0].device_kind.lower()
    except Exception:
        return 1
    return 2 if ("v7" in kind or "7x" in kind) else 1


def _make_kernel(R_pad, Q, QE, WP, margin):
    """R_pad: padded activation row count; Q = (H+2)*(W+2); QE = Q + 2*margin."""
    TAP = WP + 1   # max tap lane offset (covers +/- (WP+1))
    starts = [margin + (kh - 1) * WP + (kw - 1)
              for kh in range(KSIZE) for kw in range(KSIZE)]

    def fused_conv(ext_v, w_ref, ones_row):
        # ext_v: (R_pad, QE) activation with lane margins.
        # w_ref: (R_pad, 9*R_pad + 1) batch-block-diag folded weights, last col = bias.
        # One MXU matmul per conv stage: concat the 9 tap slices + ones row on the
        # contraction (sublane) axis.  Each piece is 8-row aligned -> cheap concat.
        rhs = jnp.concatenate([ext_v[:, st:st + Q] for st in starts] + [ones_row],
                              axis=0)                                   # (9*R_pad+1, Q)
        return jnp.dot(w_ref[...], rhs, preferred_element_type=jnp.float32)  # (R_pad, Q)

    def kernel(x_ref, w1_ref, w2_ref, wd_ref, bd_ref, msk_ref, out_ref, ext_ref):
        interior = msk_ref[...]                                 # (1, Q) 1.0 inside image
        ones_row = jnp.ones((1, Q), jnp.float32)                # bias row (hoisted once)

        # ---- stage 1: conv1 + folded BN1 + ReLU (input already margin-padded) -----
        y1 = fused_conv(x_ref[0], w1_ref, ones_row)             # (R_pad, Q)
        y1 = jnp.maximum(y1, 0.0) * interior                    # zero the padding ring

        # ---- stage 2: stage y1 into the margin buffer, conv2 + BN2 + ReLU ---------
        # Only the two tap strips need to be zero; the interior is fully overwritten.
        ext_ref[:, margin - TAP:margin] = jnp.zeros((R_pad, TAP), jnp.float32)
        ext_ref[:, margin + Q:margin + Q + TAP] = jnp.zeros((R_pad, TAP), jnp.float32)
        ext_ref[:, margin:margin + Q] = y1                      # lane-aligned store
        y2 = fused_conv(ext_ref[...], w2_ref, ones_row)         # (R_pad, Q)
        y2 = jnp.maximum(y2, 0.0)

        # ---- dense over W via block-diagonal weight; 128-lane dense output store ---
        out_ref[0] = jnp.dot(y2, wd_ref[...],
                             preferred_element_type=jnp.float32) + bd_ref[...]

    return kernel


def _expand_conv_weight(wf, bf, Bt, R_pad):
    """(C,C,3,3) folded conv weight -> (R_pad, 9*R_pad+1) batch-block-diag matrix.

    Row r = b*C + co, col k*R_pad + b*C + ci holds wf[co, ci, kh, kw] (k = kh*3+kw);
    last column holds the bias (contracted against a constant-ones RHS row)."""
    C = wf.shape[0]
    R = Bt * C
    w3 = jnp.transpose(wf, (0, 2, 3, 1)).reshape(C, KSIZE * KSIZE, C)   # [co, k, ci]
    eye = jnp.eye(Bt, dtype=wf.dtype)
    wbig = jnp.einsum('ab,okc->aokbc', eye, w3).reshape(R, KSIZE * KSIZE, R)
    wbig = jnp.pad(wbig, ((0, R_pad - R), (0, 0), (0, R_pad - R)))
    wbig = wbig.reshape(R_pad, KSIZE * KSIZE * R_pad)
    bcol = jnp.pad(jnp.tile(bf, Bt), (0, R_pad - R)).reshape(R_pad, 1)
    return jnp.concatenate([wbig, bcol], axis=1)


@functools.partial(jax.jit, static_argnames=("bt",))
def _forward(x, w1, b1, g1, beta1, m1, v1, w2, b2, g2, beta2, m2, v2, wd, bd, *, bt):
    B, C, H, W = x.shape
    OUT = wd.shape[0]
    OUT_P = 8                            # pad 7 -> 8 so H*OUT_P = 128 lanes
    HP, WP = H + 2 * PAD, W + 2 * PAD
    Q = HP * WP                          # 324
    MARGIN = 128                         # lane-aligned interior store into the scratch
    QE = Q + 2 * MARGIN                  # 580
    NOUT = H * OUT_P                     # 128
    G = B // bt                          # grid steps
    R = bt * C                           # live activation rows per step
    R_pad = ((R + 7) // 8) * 8           # pad rows to a full sublane tile

    # ---- fold BatchNorm (inference mode) into conv weights / bias -----------------
    s1 = g1 / jnp.sqrt(v1 + EPS)
    s2 = g2 / jnp.sqrt(v2 + EPS)
    w1f = w1 * s1[:, None, None, None]
    b1f = (b1 - m1) * s1 + beta1
    w2f = w2 * s2[:, None, None, None]
    b2f = (b2 - m2) * s2 + beta2

    w1big = _expand_conv_weight(w1f, b1f, bt, R_pad)             # (R_pad, 9*R_pad+1)
    w2big = _expand_conv_weight(w2f, b2f, bt, R_pad)

    # ---- input: zero-pad spatially, flatten to Q lanes, add lane margins ----------
    xpad = jnp.pad(x, ((0, 0), (0, 0), (PAD, PAD), (PAD, PAD)))
    xext = jnp.pad(xpad.reshape(B, C, Q), ((0, 0), (0, 0), (MARGIN, MARGIN)))
    xext = xext.reshape(G, R, QE)
    xext = jnp.pad(xext, ((0, 0), (0, R_pad - R), (0, 0)))       # (G, R_pad, QE)

    # interior mask over padded-flattened index q = hp*WP + wp
    hh = jnp.arange(HP)
    ww = jnp.arange(WP)
    inter2d = ((hh >= PAD) & (hh < PAD + H))[:, None] & \
              ((ww >= PAD) & (ww < PAD + W))[None, :]
    interior = inter2d.reshape(1, Q).astype(jnp.float32)

    # block-diagonal dense weight with OUT padded to 8 (128-lane output)
    wd_p = jnp.concatenate([jnp.transpose(wd),
                            jnp.zeros((W, OUT_P - OUT), jnp.float32)], axis=1)  # (W, 8)
    h_i = jnp.arange(H)
    w_i = jnp.arange(W)
    rows = (h_i[:, None] + PAD) * WP + (w_i[None, :] + PAD)          # (H, W)
    cols = h_i[:, None] * OUT_P + jnp.arange(OUT_P)[None, :]         # (H, 8)
    wd_big = jnp.zeros((Q, NOUT), jnp.float32).at[
        rows[:, :, None], cols[:, None, :]].set(
        jnp.broadcast_to(wd_p[None, :, :], (H, W, OUT_P)))
    bd_big = jnp.tile(jnp.concatenate([bd, jnp.zeros((OUT_P - OUT,), jnp.float32)]),
                      H).reshape(1, NOUT)

    kernel = _make_kernel(R_pad, Q, QE, WP, MARGIN)

    KC = KSIZE * KSIZE * R_pad + 1
    flops = G * (2 * (2 * R_pad * KC * Q) + 2 * R_pad * Q * NOUT)
    bytes_accessed = 4 * (xext.size + w1big.size + w2big.size + wd_big.size +
                          bd_big.size + interior.size + G * R_pad * NOUT)

    out_flat = pl.pallas_call(
        kernel,
        out_shape=jax.ShapeDtypeStruct((G, R_pad, NOUT), jnp.float32),
        grid=(G,),
        in_specs=[
            pl.BlockSpec((1, R_pad, QE), lambda g: (g, 0, 0)),        # xext
            pl.BlockSpec((R_pad, KC), lambda g: (0, 0)),              # conv1 weights(+bias)
            pl.BlockSpec((R_pad, KC), lambda g: (0, 0)),              # conv2 weights(+bias)
            pl.BlockSpec((Q, NOUT), lambda g: (0, 0)),                # dense block-diag
            pl.BlockSpec((1, NOUT), lambda g: (0, 0)),                # dense bias (padded)
            pl.BlockSpec((1, Q), lambda g: (0, 0)),                   # interior mask
        ],
        out_specs=pl.BlockSpec((1, R_pad, NOUT), lambda g: (g, 0, 0)),
        scratch_shapes=[pltpu.VMEM((R_pad, QE), jnp.float32)],
        compiler_params=pltpu.CompilerParams(dimension_semantics=("parallel",)),
        cost_estimate=pl.CostEstimate(flops=flops, transcendentals=0,
                                      bytes_accessed=bytes_accessed),
    )(xext, w1big, w2big, wd_big, bd_big, interior)

    # drop row padding, un-fold batch, drop the OUT padding column
    out = out_flat[:, :R, :].reshape(B, C, H, OUT_P)[..., :OUT]
    return out


def advanced_model_forward(x, w1, b1, g1, beta1, m1, v1,
                           w2, b2, g2, beta2, m2, v2, wd, bd):
    B = x.shape[0]
    n_tc = _num_tensorcores()
    # v5e/v6e (1 TC): fold the whole batch into one grid step.
    # v7x (2 TCs): keep the batch-parallel grid so both TensorCores are used.
    bt = B // n_tc if (n_tc > 1 and B % n_tc == 0) else B
    return _forward(x, w1, b1, g1, beta1, m1, v1,
                    w2, b2, g2, beta2, m2, v2, wd, bd, bt=bt)


def _reference_forward(x, w1, b1, g1, beta1, m1, v1,
                       w2, b2, g2, beta2, m2, v2, wd, bd):
    """Pure-JAX reference mirroring the PyTorch forward (BN in eval mode)."""
    def conv(x, w, b):
        y = lax.conv_general_dilated(
            x, w, window_strides=(1, 1), padding=((PAD, PAD), (PAD, PAD)),
            dimension_numbers=("NCHW", "OIHW", "NCHW"))
        return y + b[None, :, None, None]

    def bn(x, g, beta, m, v):
        return (x - m[None, :, None, None]) / jnp.sqrt(v[None, :, None, None] + EPS) \
            * g[None, :, None, None] + beta[None, :, None, None]

    y = jnp.maximum(bn(conv(x, w1, b1), g1, beta1, m1, v1), 0.0)
    y = jnp.maximum(bn(conv(y, w2, b2), g2, beta2, m2, v2), 0.0)
    return jnp.einsum("nchw,ow->ncho", y, wd) + bd


if __name__ == "__main__":
    key = jax.random.PRNGKey(0)
    ks = jax.random.split(key, 16)

    B, C, H, W = 2, 3, 16, 16
    OUT = 7

    x = jax.random.normal(ks[0], (B, C, H, W), jnp.float32)

    # conv1: Conv2d(3, 3, k=3), conv2: Conv2d(3, 3, k=3)
    w1 = jax.random.normal(ks[1], (C, C, KSIZE, KSIZE), jnp.float32) * 0.2
    b1 = jax.random.normal(ks[2], (C,), jnp.float32) * 0.1
    w2 = jax.random.normal(ks[3], (C, C, KSIZE, KSIZE), jnp.float32) * 0.2
    b2 = jax.random.normal(ks[4], (C,), jnp.float32) * 0.1

    # BatchNorm2d(3) params + running stats (inference mode)
    g1 = 1.0 + 0.1 * jax.random.normal(ks[5], (C,), jnp.float32)
    beta1 = 0.1 * jax.random.normal(ks[6], (C,), jnp.float32)
    m1 = 0.1 * jax.random.normal(ks[7], (C,), jnp.float32)
    v1 = 1.0 + 0.1 * jax.nn.softplus(jax.random.normal(ks[8], (C,), jnp.float32))
    g2 = 1.0 + 0.1 * jax.random.normal(ks[9], (C,), jnp.float32)
    beta2 = 0.1 * jax.random.normal(ks[10], (C,), jnp.float32)
    m2 = 0.1 * jax.random.normal(ks[11], (C,), jnp.float32)
    v2 = 1.0 + 0.1 * jax.nn.softplus(jax.random.normal(ks[12], (C,), jnp.float32))

    # dense: Linear(16, 7)
    wd = jax.random.normal(ks[13], (OUT, W), jnp.float32) * 0.2
    bd = jax.random.normal(ks[14], (OUT,), jnp.float32) * 0.1

    args = (x, w1, b1, g1, beta1, m1, v1, w2, b2, g2, beta2, m2, v2, wd, bd)

    out = advanced_model_forward(*args)
    out = jax.block_until_ready(out)

    ref = _reference_forward(*args)
    assert out.shape == (B, C, H, OUT), out.shape
    assert jnp.allclose(out, ref, atol=1e-4, rtol=1e-4), \
        f"max abs diff {jnp.max(jnp.abs(out - ref))}"

    print("KERNEL_OK")
</pallas_src>

<mosaic_0001>
module attributes {stable_mosaic.version = 11 : i64} {
  func.func @kernel(%arg0: i32, %arg1: memref<1x8x580xf32, #tpu.memory_space<vmem>>, %arg2: memref<8x73xf32, #tpu.memory_space<vmem>>, %arg3: memref<8x73xf32, #tpu.memory_space<vmem>>, %arg4: memref<324x128xf32, #tpu.memory_space<vmem>>, %arg5: memref<1x128xf32, #tpu.memory_space<vmem>>, %arg6: memref<1x324xf32, #tpu.memory_space<vmem>>, %arg7: memref<1x8x128xf32, #tpu.memory_space<vmem>>, %arg8: memref<8x580xf32, #tpu.memory_space<vmem>>) attributes {dimension_semantics = [#tpu.dimension_semantics<parallel>], iteration_bounds = array<i64: 1>, scalar_prefetch = 0 : i64, scratch_operands = 1 : i64, tpu.core_type = #tpu.core_type<tc>, window_params = [{transform_indices = @transform_0, window_bounds = array<i64: 1, 8, 580>}, {pipeline_mode = #tpu.pipeline_mode<synchronous>, transform_indices = @transform_1, window_bounds = array<i64: 8, 73>}, {pipeline_mode = #tpu.pipeline_mode<synchronous>, transform_indices = @transform_2, window_bounds = array<i64: 8, 73>}, {pipeline_mode = #tpu.pipeline_mode<synchronous>, transform_indices = @transform_3, window_bounds = array<i64: 324, 128>}, {pipeline_mode = #tpu.pipeline_mode<synchronous>, transform_indices = @transform_4, window_bounds = array<i64: 1, 128>}, {pipeline_mode = #tpu.pipeline_mode<synchronous>, transform_indices = @transform_5, window_bounds = array<i64: 1, 324>}, {transform_indices = @transform_6, window_bounds = array<i64: 1, 8, 128>}]} {
    %c0 = arith.constant 0 : index
    %c0_0 = arith.constant 0 : index
    %0 = vector.load %arg6[%c0, %c0_0] : memref<1x324xf32, #tpu.memory_space<vmem>>, vector<1x324xf32>
    %cst = arith.constant 1.000000e+00 : f32
    %1 = vector.broadcast %cst : f32 to vector<1x324xf32>
    %c0_1 = arith.constant 0 : index
    %c0_2 = arith.constant 0 : index
    %c0_3 = arith.constant 0 : index
    %2 = vector.load %arg1[%c0_1, %c0_2, %c0_3] : memref<1x8x580xf32, #tpu.memory_space<vmem>>, vector<1x8x580xf32>
    %3 = vector.shape_cast %2 : vector<1x8x580xf32> to vector<8x580xf32>
    %4 = vector.extract_strided_slice %3 {offsets = [0, 109], sizes = [8, 324], strides = [1, 1]} : vector<8x580xf32> to vector<8x324xf32>
    %5 = vector.extract_strided_slice %3 {offsets = [0, 110], sizes = [8, 324], strides = [1, 1]} : vector<8x580xf32> to vector<8x324xf32>
    %6 = vector.extract_strided_slice %3 {offsets = [0, 111], sizes = [8, 324], strides = [1, 1]} : vector<8x580xf32> to vector<8x324xf32>
    %7 = vector.extract_strided_slice %3 {offsets = [0, 127], sizes = [8, 324], strides = [1, 1]} : vector<8x580xf32> to vector<8x324xf32>
    %8 = vector.extract_strided_slice %3 {offsets = [0, 128], sizes = [8, 324], strides = [1, 1]} : vector<8x580xf32> to vector<8x324xf32>
    %9 = vector.extract_strided_slice %3 {offsets = [0, 129], sizes = [8, 324], strides = [1, 1]} : vector<8x580xf32> to vector<8x324xf32>
    %10 = vector.extract_strided_slice %3 {offsets = [0, 145], sizes = [8, 324], strides = [1, 1]} : vector<8x580xf32> to vector<8x324xf32>
    %11 = vector.extract_strided_slice %3 {offsets = [0, 146], sizes = [8, 324], strides = [1, 1]} : vector<8x580xf32> to vector<8x324xf32>
    %12 = vector.extract_strided_slice %3 {offsets = [0, 147], sizes = [8, 324], strides = [1, 1]} : vector<8x580xf32> to vector<8x324xf32>
    %13 = tpu.concatenate %4, %5, %6, %7, %8, %9, %10, %11, %12, %1 in 0 : vector<8x324xf32>, vector<8x324xf32>, vector<8x324xf32>, vector<8x324xf32>, vector<8x324xf32>, vector<8x324xf32>, vector<8x324xf32>, vector<8x324xf32>, vector<8x324xf32>, vector<1x324xf32> -> vector<73x324xf32>
    %c0_4 = arith.constant 0 : index
    %c0_5 = arith.constant 0 : index
    %14 = vector.load %arg2[%c0_4, %c0_5] : memref<8x73xf32, #tpu.memory_space<vmem>>, vector<8x73xf32>
    %cst_6 = arith.constant dense<0.000000e+00> : vector<8x324xf32>
    %15 = tpu.matmul %14, %13, %cst_6 {dimension_numbers = #tpu.dot_dimension_numbers<[1], [0], [0], [1], [0, 0, 1, 1], [], []>} : vector<8x73xf32>, vector<73x324xf32>, vector<8x324xf32> -> vector<8x324xf32>
    %cst_7 = arith.constant 0.000000e+00 : f32
    %16 = vector.broadcast %cst_7 : f32 to vector<8x324xf32>
    %17 = arith.maximumf %15, %16 : vector<8x324xf32>
    %18 = vector.broadcast %0 : vector<1x324xf32> to vector<8x324xf32>
    %19 = arith.mulf %17, %18 : vector<8x324xf32>
    %cst_8 = arith.constant 0.000000e+00 : f32
    %20 = vector.broadcast %cst_8 : f32 to vector<8x19xf32>
    %c0_9 = arith.constant 0 : index
    %c109 = arith.constant 109 : index
    %21 = vector.load %arg8[%c0_9, %c109] : memref<8x580xf32, #tpu.memory_space<vmem>>, vector<8x19xf32>
    tpu.vector_store %arg8[%c0_9, %c109], %20 {strides = array<i32>} : memref<8x580xf32, #tpu.memory_space<vmem>>, vector<8x19xf32>,
    %cst_10 = arith.constant 0.000000e+00 : f32
    %22 = vector.broadcast %cst_10 : f32 to vector<8x19xf32>
    %c0_11 = arith.constant 0 : index
    %c452 = arith.constant 452 : index
    %23 = vector.load %arg8[%c0_11, %c452] : memref<8x580xf32, #tpu.memory_space<vmem>>, vector<8x19xf32>
    tpu.vector_store %arg8[%c0_11, %c452], %22 {strides = array<i32>} : memref<8x580xf32, #tpu.memory_space<vmem>>, vector<8x19xf32>,
    %c0_12 = arith.constant 0 : index
    %c128 = arith.constant 128 : index
    %24 = vector.load %arg8[%c0_12, %c128] : memref<8x580xf32, #tpu.memory_space<vmem>>, vector<8x324xf32>
    tpu.vector_store %arg8[%c0_12, %c128], %19 {strides = array<i32>} : memref<8x580xf32, #tpu.memory_space<vmem>>, vector<8x324xf32>,
    %c0_13 = arith.constant 0 : index
    %c0_14 = arith.constant 0 : index
    %25 = vector.load %arg8[%c0_13, %c0_14] : memref<8x580xf32, #tpu.memory_space<vmem>>, vector<8x580xf32>
    %26 = vector.extract_strided_slice %25 {offsets = [0, 109], sizes = [8, 324], strides = [1, 1]} : vector<8x580xf32> to vector<8x324xf32>
    %27 = vector.extract_strided_slice %25 {offsets = [0, 110], sizes = [8, 324], strides = [1, 1]} : vector<8x580xf32> to vector<8x324xf32>
    %28 = vector.extract_strided_slice %25 {offsets = [0, 111], sizes = [8, 324], strides = [1, 1]} : vector<8x580xf32> to vector<8x324xf32>
    %29 = vector.extract_strided_slice %25 {offsets = [0, 127], sizes = [8, 324], strides = [1, 1]} : vector<8x580xf32> to vector<8x324xf32>
    %30 = vector.extract_strided_slice %25 {offsets = [0, 128], sizes = [8, 324], strides = [1, 1]} : vector<8x580xf32> to vector<8x324xf32>
    %31 = vector.extract_strided_slice %25 {offsets = [0, 129], sizes = [8, 324], strides = [1, 1]} : vector<8x580xf32> to vector<8x324xf32>
    %32 = vector.extract_strided_slice %25 {offsets = [0, 145], sizes = [8, 324], strides = [1, 1]} : vector<8x580xf32> to vector<8x324xf32>
    %33 = vector.extract_strided_slice %25 {offsets = [0, 146], sizes = [8, 324], strides = [1, 1]} : vector<8x580xf32> to vector<8x324xf32>
    %34 = vector.extract_strided_slice %25 {offsets = [0, 147], sizes = [8, 324], strides = [1, 1]} : vector<8x580xf32> to vector<8x324xf32>
    %35 = tpu.concatenate %26, %27, %28, %29, %30, %31, %32, %33, %34, %1 in 0 : vector<8x324xf32>, vector<8x324xf32>, vector<8x324xf32>, vector<8x324xf32>, vector<8x324xf32>, vector<8x324xf32>, vector<8x324xf32>, vector<8x324xf32>, vector<8x324xf32>, vector<1x324xf32> -> vector<73x324xf32>
    %c0_15 = arith.constant 0 : index
    %c0_16 = arith.constant 0 : index
    %36 = vector.load %arg3[%c0_15, %c0_16] : memref<8x73xf32, #tpu.memory_space<vmem>>, vector<8x73xf32>
    %cst_17 = arith.constant dense<0.000000e+00> : vector<8x324xf32>
    %37 = tpu.matmul %36, %35, %cst_17 {dimension_numbers = #tpu.dot_dimension_numbers<[1], [0], [0], [1], [0, 0, 1, 1], [], []>} : vector<8x73xf32>, vector<73x324xf32>, vector<8x324xf32> -> vector<8x324xf32>
    %cst_18 = arith.constant 0.000000e+00 : f32
    %38 = vector.broadcast %cst_18 : f32 to vector<8x324xf32>
    %39 = arith.maximumf %37, %38 : vector<8x324xf32>
    %c0_19 = arith.constant 0 : index
    %c0_20 = arith.constant 0 : index
    %40 = vector.load %arg4[%c0_19, %c0_20] : memref<324x128xf32, #tpu.memory_space<vmem>>, vector<324x128xf32>
    %cst_21 = arith.constant dense<0.000000e+00> : vector<8x128xf32>
    %41 = tpu.matmul %39, %40, %cst_21 {dimension_numbers = #tpu.dot_dimension_numbers<[1], [0], [0], [1], [0, 0, 1, 1], [], []>} : vector<8x324xf32>, vector<324x128xf32>, vector<8x128xf32> -> vector<8x128xf32>
    %c0_22 = arith.constant 0 : index
    %c0_23 = arith.constant 0 : index
    %42 = vector.load %arg5[%c0_22, %c0_23] : memref<1x128xf32, #tpu.memory_space<vmem>>, vector<1x128xf32>
    %43 = vector.broadcast %42 : vector<1x128xf32> to vector<8x128xf32>
    %44 = arith.addf %41, %43 : vector<8x128xf32>
    %c0_24 = arith.constant 0 : index
    %c0_25 = arith.constant 0 : index
    %c0_26 = arith.constant 0 : index
    %45 = vector.load %arg7[%c0_24, %c0_25, %c0_26] : memref<1x8x128xf32, #tpu.memory_space<vmem>>, vector<1x8x128xf32>
    %46 = vector.shape_cast %45 : vector<1x8x128xf32> to vector<8x128xf32>
    %47 = vector.shape_cast %44 : vector<8x128xf32> to vector<1x8x128xf32>
    tpu.vector_store %arg7[%c0_24, %c0_25, %c0_26], %47 {strides = array<i32>} : memref<1x8x128xf32, #tpu.memory_space<vmem>>, vector<1x8x128xf32>,
    return
  }
  func.func @transform_0(%arg0: i32) -> (i32, i32, i32) {
    %c0_i32 = arith.constant 0 : i32
    %c0_i32_0 = arith.constant 0 : i32
    %c0_i32_1 = arith.constant 0 : i32
    return %arg0, %c0_i32, %c0_i32_0 : i32, i32, i32
  }
  func.func @transform_1(%arg0: i32) -> (i32, i32) {
    %c0_i32 = arith.constant 0 : i32
    %c0_i32_0 = arith.constant 0 : i32
    %c0_i32_1 = arith.constant 0 : i32
    return %c0_i32, %c0_i32_0 : i32, i32
  }
  func.func @transform_2(%arg0: i32) -> (i32, i32) {
    %c0_i32 = arith.constant 0 : i32
    %c0_i32_0 = arith.constant 0 : i32
    %c0_i32_1 = arith.constant 0 : i32
    return %c0_i32, %c0_i32_0 : i32, i32
  }
  func.func @transform_3(%arg0: i32) -> (i32, i32) {
    %c0_i32 = arith.constant 0 : i32
    %c0_i32_0 = arith.constant 0 : i32
    %c0_i32_1 = arith.constant 0 : i32
    return %c0_i32, %c0_i32_0 : i32, i32
  }
  func.func @transform_4(%arg0: i32) -> (i32, i32) {
    %c0_i32 = arith.constant 0 : i32
    %c0_i32_0 = arith.constant 0 : i32
    %c0_i32_1 = arith.constant 0 : i32
    return %c0_i32, %c0_i32_0 : i32, i32
  }
  func.func @transform_5(%arg0: i32) -> (i32, i32) {
    %c0_i32 = arith.constant 0 : i32
    %c0_i32_0 = arith.constant 0 : i32
    %c0_i32_1 = arith.constant 0 : i32
    return %c0_i32, %c0_i32_0 : i32, i32
  }
  func.func @transform_6(%arg0: i32) -> (i32, i32, i32) {
    %c0_i32 = arith.constant 0 : i32
    %c0_i32_0 = arith.constant 0 : i32
    %c0_i32_1 = arith.constant 0 : i32
    return %arg0, %c0_i32, %c0_i32_0 : i32, i32, i32
  }
}

</mosaic_0001>

<bundles_post_ra>
// kernel: tile.18
= control target key start
LH: loop header
LB: loop body
LE: loop exit
PB: predicated region body
PF: predicated region fallthrough
CT: control target
= control target key end

     0   :  { %s22_s0 = inlined_call_operand.vmem [shape: f32[3], index: 0, kind: input, shape index: {}]   ;;  %s23_s1 = inlined_call_operand.vmem [shape: f32[2,3], index: 1, kind: output, shape index: {}]  }
   0x1   :  { %v4_v0 = vld [vmem:[%s22_s0] ss:$0 sm:$0xff] }
   0x2   :  { %5 = vst [vmem:[%s23_s1] sm:$0x3] %v4_v0 }

// kernel: tile.19
= control target key start
LH: loop header
LB: loop body
LE: loop exit
PB: predicated region body
PF: predicated region fallthrough
CT: control target
= control target key end

     0   :  { %vm7_vm0 = vcmask 23552   ;;  %vm13_vm1 = vcmask 48152   ;;  %s39_s0 = inlined_call_operand.vmem [shape: f32[2,3], index: 0, kind: input, shape index: {}]   ;;  %s40_s1 = inlined_call_operand.vmem [shape: f32[6], index: 1, kind: output, shape index: {}]  }
   0x1   :  { %v4_v0 = vld [vmem:[%s39_s0] sm:$0x3]  ;;  %s22_s0 = smov 3  }
   0x2   :  { %5 = vst [vmem:[#allocation1] sm:$0x3] %v4_v0 }
   0x9   :  { %v10_v1 = vld [vmem:[#allocation1 + $0x1] sm:$0x1]   ;;  %v6_v2 = vld [vmem:[#allocation1] sm:$0x1]  }
   0xa   :  { %11 = vrot.lane.b32.xlu0 %v10_v1, %s22_s0  ;;  %8 = vst.msk [vmem:[#allocation0] sm:$0x1] %vm7_vm0, %v6_v2  }
  0x7c   :  { %v12_v3 = vpop.permute.xlu0 %11  }
  0x7d   :  { %14 = vst.msk [vmem:[#allocation0] sm:$0x1] %vm13_vm1, %v12_v3  }
  0x84   :  { %v18_v4 = vld [vmem:[#allocation0] sm:$0x1] }
  0x85   :  { %20 = vst [vmem:[%s40_s1] sm:$0x1] %v18_v4 }

// kernel: tile.28
= control target key start
LH: loop header
LB: loop body
LE: loop exit
PB: predicated region body
PF: predicated region fallthrough
CT: control target
= control target key end

     0   :  { %s28_s0 = inlined_call_operand.vmem [shape: f32[8], index: 0, kind: input, shape index: {}]   ;;  %s29_s1 = inlined_call_operand.vmem [shape: f32[16,8], index: 1, kind: output, shape index: {}]  }
   0x1   :  { %v4_v0 = vld [vmem:[%s28_s0] ss:$0 sm:$0xff] }
   0x2   :  { %5 = vst [vmem:[%s29_s1] sm:$0xff] %v4_v0  ;;  %8 = vst [vmem:[%s29_s1 + $0x8] sm:$0xff] %v4_v0 }

// kernel: tile.29
= control target key start
LH: loop header
LB: loop body
LE: loop exit
PB: predicated region body
PF: predicated region fallthrough
CT: control target
= control target key end

     0   :  { %s131_s10 = smov 120   ;;  %s132_s11 = smov 104   ;;  %vm3_vm0 = vcmask 64512   ;;  %vm9_vm1 = vcmask 1048512   ;;  %vm15_vm2 = vcmask 982912   ;;  %vm21_vm3 = vcmask 917312   ;;  %s207_s0 = inlined_call_operand.vmem [shape: f32[16,8], index: 0, kind: input, shape index: {}]   ;;  %s208_s1 = inlined_call_operand.vmem [shape: f32[1,128], index: 1, kind: output, shape index: {}]  }
   0x1   :  { %v101_v0 = vld [vmem:[%s207_s0 + $0xf] sm:$0x1]   ;;  %v103_v1 = vld [vmem:[%s207_s0 + $0xd] sm:$0x1]   ;;  %v102_v2 = vld [vmem:[%s207_s0 + $0xe] sm:$0x1]  }
   0x2   :  { %7 = vrot.lane.b32.xlu0 %v101_v0, %s131_s10  ;;  %19 = vrot.lane.b32.xlu1 %v103_v1, %s132_s11  ;;  %v104_v3 = vld [vmem:[%s207_s0 + $0xc] sm:$0x1]   ;;  %s133_s16 = smov 112   ;;  %s134_s17 = smov 96   ;;  %v105_v4 = vld [vmem:[%s207_s0 + $0xb] sm:$0x1]  }
   0x3   :  { %v106_v5 = vld [vmem:[%s207_s0 + $0xa] sm:$0x1]   ;;  %v2_v6 = vld [vmem:[%s207_s0] sm:$0x1]   ;;  %s135_s24 = smov 88   ;;  %s136_s25 = smov 80  }
   0x4   :  { %4 = vst.msk [vmem:[#allocation0] sm:$0x1] %vm3_vm0, %v2_v6   ;;  %v107_v7 = vld [vmem:[%s207_s0 + $0x9] sm:$0x1]   ;;  %v108_v8 = vld [vmem:[%s207_s0 + $0x8] sm:$0x1]  }
   0x5   :  { %s137_s30 = smov 72   ;;  %s138_s2 = smov 64   ;;  %v109_v9 = vld [vmem:[%s207_s0 + $0x7] sm:$0x1]   ;;  %v110_v10 = vld [vmem:[%s207_s0 + $0x6] sm:$0x1]  }
   0x6   :  { %13 = vrot.lane.b32.xlu0 %v102_v2, %s133_s16  ;;  %25 = vrot.lane.b32.xlu1 %v104_v3, %s134_s17  ;;  %s139_s7 = smov 56   ;;  %s140_s8 = smov 48   ;;  %v111_v11 = vld [vmem:[%s207_s0 + $0x5] sm:$0x1]   ;;  %v112_v12 = vld [vmem:[%s207_s0 + $0x4] sm:$0x1]  }
   0x7   :  { %s141_s13 = smov 40   ;;  %s142_s14 = smov 32   ;;  %v113_v13 = vld [vmem:[%s207_s0 + $0x3] sm:$0x1]   ;;  %v114_v14 = vld [vmem:[%s207_s0 + $0x2] sm:$0x1]  }
   0x8   :  { %s143_s19 = smov 24   ;;  %s144_s20 = smov 16   ;;  %v115_v15 = vld [vmem:[%s207_s0 + $0x1] sm:$0x1]   ;;  %vm27_vm4 = vcmask 851712   ;;  %vm33_vm5 = vcmask 786112  }
   0x9   :  { %s145_s0 = smov 8   ;;  %vm39_vm6 = vcmask 720512   ;;  %vm45_vm7 = vcmask 654912   ;;  %vm51_vm8 = vcmask 589312   ;;  %vm57_vm9 = vcmask 523712  }
   0xa   :  { %31 = vrot.lane.b32.xlu0 %v105_v4, %s135_s24  ;;  %37 = vrot.lane.b32.xlu1 %v106_v5, %s136_s25  ;;  %vm63_vm10 = vcmask 458112   ;;  %vm69_vm11 = vcmask 392512   ;;  %vm75_vm12 = vcmask 326912   ;;  %vm81_vm13 = vcmask 261312  }
   0xb   :  { %vm87_vm14 = vcmask 195712   ;;  %vm93_vm15 = vcmask 130112  }
   0xe   :  { %43 = vrot.lane.b32.xlu0 %v107_v7, %s137_s30  ;;  %49 = vrot.lane.b32.xlu1 %v108_v8, %s138_s2 }
  0x12   :  { %55 = vrot.lane.b32.xlu0 %v109_v9, %s139_s7  ;;  %61 = vrot.lane.b32.xlu1 %v110_v10, %s140_s8 }
  0x16   :  { %67 = vrot.lane.b32.xlu0 %v111_v11, %s141_s13  ;;  %73 = vrot.lane.b32.xlu1 %v112_v12, %s142_s14 }
  0x1a   :  { %79 = vrot.lane.b32.xlu0 %v113_v13, %s143_s19  ;;  %85 = vrot.lane.b32.xlu1 %v114_v14, %s144_s20 }
  0x1e   :  { %91 = vrot.lane.b32.xlu0 %v115_v15, %s145_s0 }
  0x74   :  { %v8_v16 = vpop.permute.xlu0 %7   ;;  %v20_v17 = vpop.permute.xlu1 %19  }
  0x75   :  { %10 = vst.msk [vmem:[#allocation0] sm:$0x1] %vm9_vm1, %v8_v16  }
  0x78   :  { %v14_v18 = vpop.permute.xlu0 %13   ;;  %v26_v19 = vpop.permute.xlu1 %25  }
  0x79   :  { %16 = vst.msk [vmem:[#allocation0] sm:$0x1] %vm15_vm2, %v14_v18  }
  0x7a   :  { %22 = vst.msk [vmem:[#allocation0] sm:$0x1] %vm21_vm3, %v20_v17  }
  0x7b   :  { %28 = vst.msk [vmem:[#allocation0] sm:$0x1] %vm27_vm4, %v26_v19  }
  0x7c   :  { %v32_v20 = vpop.permute.xlu0 %31   ;;  %v38_v21 = vpop.permute.xlu1 %37  }
  0x7d   :  { %34 = vst.msk [vmem:[#allocation0] sm:$0x1] %vm33_vm5, %v32_v20  }
  0x7e   :  { %40 = vst.msk [vmem:[#allocation0] sm:$0x1] %vm39_vm6, %v38_v21  }
  0x80   :  { %v44_v22 = vpop.permute.xlu0 %43   ;;  %v50_v23 = vpop.permute.xlu1 %49  }
  0x81   :  { %46 = vst.msk [vmem:[#allocation0] sm:$0x1] %vm45_vm7, %v44_v22  }
  0x82   :  { %52 = vst.msk [vmem:[#allocation0] sm:$0x1] %vm51_vm8, %v50_v23  }
  0x84   :  { %v56_v24 = vpop.permute.xlu0 %55   ;;  %v62_v25 = vpop.permute.xlu1 %61  }
  0x85   :  { %58 = vst.msk [vmem:[#allocation0] sm:$0x1] %vm57_vm9, %v56_v24  }
  0x86   :  { %64 = vst.msk [vmem:[#allocation0] sm:$0x1] %vm63_vm10, %v62_v25  }
  0x88   :  { %v68_v26 = vpop.permute.xlu0 %67   ;;  %v74_v27 = vpop.permute.xlu1 %73  }
  0x89   :  { %70 = vst.msk [vmem:[#allocation0] sm:$0x1] %vm69_vm11, %v68_v26  }
  0x8a   :  { %76 = vst.msk [vmem:[#allocation0] sm:$0x1] %vm75_vm12, %v74_v27  }
  0x8c   :  { %v80_v28 = vpop.permute.xlu0 %79   ;;  %v86_v29 = vpop.permute.xlu1 %85  }
  0x8d   :  { %82 = vst.msk [vmem:[#allocation0] sm:$0x1] %vm81_vm13, %v80_v28  }
  0x8e   :  { %88 = vst.msk [vmem:[#allocation0] sm:$0x1] %vm87_vm14, %v86_v29  }
  0x90   :  { %v92_v30 = vpop.permute.xlu0 %91  }
  0x91   :  { %94 = vst.msk [vmem:[#allocation0] sm:$0x1] %vm93_vm15, %v92_v30  }
  0x98   :  { %v98_v31 = vld [vmem:[#allocation0] sm:$0x1] }
  0x99   :  { %100 = vst [vmem:[%s208_s1] sm:$0x1] %v98_v31 }

// kernel: _forward.1
= control target key start
LH: loop header
LB: loop body
LE: loop exit
PB: predicated region body
PF: predicated region fallthrough
CT: control target
= control target key end

     0   :  { %s1543_s29 = smov 126   ;;  %s1544_s30 = smov 127   ;;  %v1552_v19 = vmov 0.0|0.0   ;;  %vm40_vm0 = vcmask 1039360   ;;  %vm64_vm1 = vcmask 900096   ;;  %vm83_vm2 = vcmask 883712   ;;  %s2028_s0 = inlined_call_operand.vmem [shape: f32[1,8,580], index: 0, kind: input, shape index: {}]   ;;  %s2029_s1 = inlined_call_operand.vmem [shape: f32[8,73], index: 1, kind: input, shape index: {}]   ;;  %s2030_s5 = inlined_call_operand.vmem [shape: f32[1,324], index: 5, kind: input, shape index: {}]   ;;  %s2031_s3 = inlined_call_operand.vmem [shape: f32[324,128], index: 3, kind: input, shape index: {}]   ;;  %s2032_s2 = inlined_call_operand.vmem [shape: f32[8,73], index: 2, kind: input, shape index: {}]   ;;  %s2033_s4 = inlined_call_operand.vmem [shape: f32[1,128], index: 4, kind: input, shape index: {}]   ;;  %s2034_s6 = inlined_call_operand.vmem [shape: f32[1,8,128], index: 6, kind: output, shape index: {}]  }
   0x1   :  { %v25_v0 = vld [vmem:[%s2028_s0 + $0x8] sm:$0xff]  ;;  %v26_v1 = vld [vmem:[%s2028_s0 + $0x10] sm:$0xff]  ;;  %v1601_v2 = vld [vmem:[%s2028_s0] sm:$0xff]  ;;  %s1545_s7 = smov 110   ;;  %s1546_s8 = smov 109   ;;  %1146 = vmatprep.subr.bf16.mxu1 %v1552_v19  ;;  %vm101_vm3 = vcmask 744448  }
   0x2   :  { %v1268_v3 = vpack.i.bf16 %v26_v1, %v25_v0  ;;  %v27_v4 = vld [vmem:[%s2028_s0 + $0x18] sm:$0xff]  ;;  %s1547_s0 = smov 108   ;;  %s1548_s9 = smov 92   ;;  %vm52_vm4 = vcmask 1031168   ;;  %vm74_vm5 = vcmask 891904   ;;  %vm92_vm6 = vcmask 752640  }
   0x3   :  { %v1273_v5 = vpack.i.bf16 %v1601_v2, %v27_v4  ;;  %s1549_s10 = smov 91   ;;  %s1550_s11 = smov 90   ;;  %vm110_vm7 = vcmask 736256   ;;  %vm414_vm8 = vcmask 1048424   ;;  %vm1555_vm9 = vmmov 0  }
   0x4   :  { %1269 = vrot.lane.b32.xlu1 %v1268_v3, %s1543_s29  ;;  %1259 = vrot.lane.b32.xlu0 %v1268_v3, %s1544_s30  ;;  %s1551_s12 = smov 19   ;;  %vm189_vm10 = vcmask 154624   ;;  %vm248_vm11 = vcmask 1040384   ;;  %vm1556_vm12 = vmmov 1   ;;  %vm244_vm14 = vcmask 596992  }
   0x5   :  { %vm1743_vm13 = vmpackc.low %vm248_vm11, %vm1556_vm12  ;;  %vm416_vm15 = vcmask 712224  }
   0x8   :  { %1274 = vrot.lane.b32.xlu1 %v1273_v5, %s1543_s29  ;;  %1264 = vrot.lane.b32.xlu0 %v1273_v5, %s1544_s30 }
   0xc   :  { %1284 = vrot.lane.b32.xlu1 %v1273_v5, %s1545_s7  ;;  %1279 = vrot.lane.b32.xlu0 %v1268_v3, %s1545_s7 }
  0x10   :  { %72 = vrot.lane.b32.xlu1 %v27_v4, %s1546_s8  ;;  %1289 = vrot.lane.b32.xlu0 %v1268_v3, %s1546_s8 }
  0x14   :  { %81 = vrot.lane.b32.xlu1 %v27_v4, %s1547_s0  ;;  %1294 = vrot.lane.b32.xlu0 %v1268_v3, %s1547_s0 }
  0x18   :  { %1299 = vrot.lane.b32.xlu0 %v1268_v3, %s1548_s9  ;;  %90 = vrot.lane.b32.xlu1 %v27_v4, %s1548_s9 }
  0x1c   :  { %1304 = vrot.lane.b32.xlu0 %v1268_v3, %s1549_s10  ;;  %99 = vrot.lane.b32.xlu1 %v27_v4, %s1549_s10 }
  0x20   :  { %1309 = vrot.lane.b32.xlu0 %v1268_v3, %s1550_s11  ;;  %108 = vrot.lane.b32.xlu1 %v27_v4, %s1550_s11 }
  0x24   :  { %1314 = vrot.lane.b32.xlu0 %v1268_v3, %s1551_s12 }
  0x76   :  { %v1624_v6 = vpop.permute.xlu1 %1269  ;;  %v1260_v7 = vpop.permute.xlu0 %1259 }
  0x77   :  { %v1262_v20 = vunpack.i.h.bf16 %v1260_v7  ;;  %v1261_v21 = vunpack.i.l.bf16 %v1260_v7  ;;  %v1272_v48 = vunpack.i.h.bf16 %v1624_v6  ;;  %v1271_v51 = vunpack.i.l.bf16 %v1624_v6 }
  0x79   :  { %v42_v32 = vsel %vm40_vm0, %v1261_v21, %v1262_v20  ;;  %v54_v57 = vsel %vm52_vm4, %v1271_v51, %v1272_v48 }
  0x7a   :  { %v1626_v8 = vpop.permute.xlu1 %1274  ;;  %v1265_v9 = vpop.permute.xlu0 %1264 }
  0x7b   :  { %v1266_v10 = vunpack.i.l.bf16 %v1265_v9  ;;  %v1276_v11 = vunpack.i.l.bf16 %v1626_v8  ;;  %v1267_v38 = vunpack.i.h.bf16 %v1265_v9  ;;  %v1277_v55 = vunpack.i.h.bf16 %v1626_v8 }
  0x7d   :  { %v1318_v12 = vpack.i.bf16 %v1266_v10, %v27_v4  ;;  %v43_v29 = vsel %vm40_vm0, %v1262_v20, %v1266_v10  ;;  %v41_v49 = vsel %vm40_vm0, %v1267_v38, %v1261_v21  ;;  %v55_v58 = vsel %vm52_vm4, %v1272_v48, %v1276_v11 }
  0x7e   :  { %v1629_v13 = vpop.permute.xlu1 %1284  ;;  %v1631_v14 = vpop.permute.xlu0 %1279  ;;  %v1343_v34 = vpack.i.bf16 %v43_v29, %v42_v32  ;;  %v1348_v54 = vpack.i.bf16 %v41_v49, %v1601_v2  ;;  %v1353_v62 = vpack.i.bf16 %v55_v58, %v54_v57  ;;  %v53_v1 = vsel %vm52_vm4, %v1277_v55, %v1271_v51 }
  0x7f   :  { %v1286_v15 = vunpack.i.l.bf16 %v1629_v13  ;;  %1319 = vrot.lane.b32.xlu1 %v1318_v12, %s1551_s12  ;;  %v1282_v27 = vunpack.i.h.bf16 %v1631_v14  ;;  %v1281_v28 = vunpack.i.l.bf16 %v1631_v14  ;;  %v1287_v56 = vunpack.i.h.bf16 %v1629_v13 }
  0x80   :  { %v1553_v4 = vmov 1.0  }
  0x81   :  { %v1323_v16 = vpack.i.bf16 %v1286_v15, %v1276_v11  ;;  %v66_v36 = vsel %vm64_vm1, %v1281_v28, %v1282_v27  ;;  %v67_v37 = vsel %vm64_vm1, %v1282_v27, %v1286_v15  ;;  %v65_v2 = vsel %vm64_vm1, %v1287_v56, %v1281_v28 }
  0x82   :  { %v1635_v17 = vpop.permute.xlu1 %72  ;;  %v1637_v18 = vpop.permute.xlu0 %1289  ;;  %v1358_v42 = vpack.i.bf16 %v67_v37, %v66_v36  ;;  %v1363_v3 = vpack.i.bf16 %v65_v2, %v53_v1 }
  0x83   :  { %1324 = vrot.lane.b32.xlu1 %v1323_v16, %s1551_s12  ;;  %v1291_v24 = vunpack.i.l.bf16 %v1637_v18  ;;  %v1292_v0 = vunpack.i.h.bf16 %v1637_v18 }
  0x85   :  { %v75_v7 = vsel %vm74_vm5, %v1291_v24, %v1292_v0  ;;  %v76_v8 = vsel %vm74_vm5, %v1292_v0, %v1635_v17 }
  0x86   :  { %v82_v22 = vpop.permute.xlu1 %81  ;;  %v1295_v23 = vpop.permute.xlu0 %1294  ;;  %v1368_v10 = vpack.i.bf16 %v76_v8, %v75_v7 }
  0x87   :  { %v1333_v25 = vpack.i.bf16 %v82_v22, %v1635_v17  ;;  %v1296_v26 = vunpack.i.l.bf16 %v1295_v23  ;;  %v1297_v35 = vunpack.i.h.bf16 %v1295_v23  ;;  %v1554_v17 = vmov 0.0  }
  0x88   :  { %315 = vmatprep.mubr.f32.mxu0 %v1554_v17  ;;  %415 = vst.msk [vmem:[#allocation2] sm:$0xff] %vm414_vm8, %v1554_v17  ;;  %1077 = vmatprep.mubr.msk.f32.mxu1 %vm1555_vm9, %v1554_v17  ;;  %vm420_vm8 = vcmask 556032  }
  0x89   :  { %v1328_v30 = vpack.i.bf16 %v1296_v26, %v1291_v24  ;;  %1334 = vrot.lane.b32.xlu1 %v1333_v25, %s1551_s12  ;;  %v84_v44 = vsel %vm83_vm2, %v1296_v26, %v1297_v35  ;;  %v85_v45 = vsel %vm83_vm2, %v1297_v35, %v82_v22  ;;  %417 = vst.msk [vmem:[#allocation2 + $0x18] sm:$0xff] %vm416_vm15, %v1554_v17 }
  0x8a   :  { %v1649_v31 = vpop.permute.xlu0 %1299  ;;  %v91_v33 = vpop.permute.xlu1 %90  ;;  %v1373_v50 = vpack.i.bf16 %v85_v45, %v84_v44 }
  0x8b   :  { %1329 = vrot.lane.b32.xlu0 %v1328_v30, %s1551_s12  ;;  %v1301_v40 = vunpack.i.l.bf16 %v1649_v31  ;;  %v1302_v6 = vunpack.i.h.bf16 %v1649_v31 }
  0x8d   :  { %1344 = vrot.lane.b32.xlu1 %v1343_v34, %s1551_s12  ;;  %v93_v12 = vsel %vm92_vm6, %v1301_v40, %v1302_v6  ;;  %v94_v13 = vsel %vm92_vm6, %v1302_v6, %v91_v33 }
  0x8e   :  { %v1305_v39 = vpop.permute.xlu0 %1304  ;;  %v100_v47 = vpop.permute.xlu1 %99  ;;  %v1378_v16 = vpack.i.bf16 %v94_v13, %v93_v12 }
  0x8f   :  { %v1306_v41 = vunpack.i.l.bf16 %v1305_v39  ;;  %v1307_v43 = vunpack.i.h.bf16 %v1305_v39  ;;  %v1388_v61 = vpack.i.bf16 %v100_v47, %v91_v33 }
  0x91   :  { %v1338_v46 = vpack.i.bf16 %v1306_v41, %v1301_v40  ;;  %1359 = vrot.lane.b32.xlu1 %v1358_v42, %s1551_s12  ;;  %v102_v52 = vsel %vm101_vm3, %v1306_v41, %v1307_v43  ;;  %v103_v53 = vsel %vm101_vm3, %v1307_v43, %v100_v47 }
  0x92   :  { %v1310_v59 = vpop.permute.xlu0 %1309  ;;  %v1383_v60 = vpack.i.bf16 %v103_v53, %v102_v52  ;;  %v109_v11 = vpop.permute.xlu1 %108 }
  0x93   :  { %1339 = vrot.lane.b32.xlu0 %v1338_v46, %s1551_s12  ;;  %v1311_v63 = vunpack.i.l.bf16 %v1310_v59  ;;  %v1312_v9 = vunpack.i.h.bf16 %v1310_v59 }
  0x95   :  { %1374 = vrot.lane.b32.xlu1 %v1373_v50, %s1551_s12  ;;  %v1393_v5 = vpack.i.bf16 %v1553_v4, %v1311_v63  ;;  %v111_v14 = vsel %vm110_vm7, %v1311_v63, %v1312_v9  ;;  %v112_v15 = vsel %vm110_vm7, %v1312_v9, %v109_v11 }
  0x96   :  { %v1398_v18 = vpack.i.bf16 %v112_v15, %v111_v14  ;;  %v1315_v22 = vpop.permute.xlu0 %1314 }
  0x97   :  { %1349 = vrot.lane.b32.xlu0 %v1348_v54, %s1551_s12  ;;  %v1317_v24 = vunpack.i.h.bf16 %v1315_v22  ;;  %v1316_v25 = vunpack.i.l.bf16 %v1315_v22 }
  0x99   :  { %1384 = vrot.lane.b32.xlu1 %v1383_v60, %s1551_s12  ;;  %v191_v32 = vsel %vm189_vm10, %v1316_v25, %v1317_v24 }
  0x9b   :  { %1354 = vrot.lane.b32.xlu0 %v1353_v62, %s1551_s12 }
  0x9d   :  { %1389 = vrot.lane.b32.xlu1 %v1388_v61, %s1551_s12 }
  0x9f   :  { %1364 = vrot.lane.b32.xlu0 %v1363_v3, %s1551_s12 }
  0xa1   :  { %1394 = vrot.lane.b32.xlu1 %v1393_v5, %s1551_s12 }
  0xa3   :  { %1369 = vrot.lane.b32.xlu0 %v1368_v10, %s1551_s12 }
  0xa7   :  { %1379 = vrot.lane.b32.xlu0 %v1378_v16, %s1551_s12 }
  0xab   :  { %1399 = vrot.lane.b32.xlu0 %v1398_v18, %s1551_s12 }
  0xaf   :  { %185 = vrot.lane.b32.xlu0 %v109_v11, %s1551_s12 }
  0xf1   :  { %v1320_v20 = vpop.permute.xlu1 %1319 }
  0xf2   :  { %v1321_v26 = vunpack.i.l.bf16 %v1320_v20  ;;  %v1322_v28 = vunpack.i.h.bf16 %v1320_v20 }
  0xf4   :  { %v192_v34 = vsel %vm189_vm10, %v1317_v24, %v1321_v26 }
  0xf5   :  { %v1325_v21 = vpop.permute.xlu1 %1324 }
  0xf6   :  { %v1327_v50 = vunpack.i.h.bf16 %v1325_v21  ;;  %v1326_v51 = vunpack.i.l.bf16 %v1325_v21 }
  0xfb   :  { %v1699_v23 = vpop.permute.xlu1 %1334 }
  0xfc   :  { %v1337_v5 = vunpack.i.h.bf16 %v1699_v23  ;;  %v1336_v6 = vunpack.i.l.bf16 %v1699_v23 }
  0xfd   :  { %v1701_v31 = vpop.permute.xlu0 %1329 }
  0xfe   :  { %v1332_v7 = vunpack.i.h.bf16 %v1701_v31  ;;  %v1331_v10 = vunpack.i.l.bf16 %v1701_v31 }
  0xff   :  { %v1345_v27 = vpop.permute.xlu1 %1344 }
 0x100   :  { %v1347_v29 = vunpack.i.h.bf16 %v1345_v27  ;;  %v1346_v30 = vunpack.i.l.bf16 %v1345_v27 }
 0x102   :  { %v194_v33 = vsel %vm189_vm10, %v1346_v30, %v1347_v29  ;;  %v195_v35 = vsel %vm189_vm10, %v1347_v29, %v1322_v28 }
 0x103   :  { %v1360_v36 = vpop.permute.xlu1 %1359  ;;  %v1124_v37 = vpack.c.bf16 %v194_v33, %v191_v32  ;;  %v1147_v38 = vpack.c.bf16 %v195_v35, %v192_v34 }
 0x104   :  { %v1362_v44 = vunpack.i.h.bf16 %v1360_v36  ;;  %v1361_v45 = vunpack.i.l.bf16 %v1360_v36 }
 0x105   :  { %v1707_v39 = vpop.permute.xlu0 %1339  ;;  %1125 = vmatprep.subr.bf16.mxu0 %v1124_v37  ;;  %1148 = vmatpush3.bf16.msra.mxu1 %v1147_v38 }
 0x106   :  { %1149 = vmatprep.subr.bf16.mxu1 %v1552_v19  ;;  %v200_v56 = vsel %vm189_vm10, %v1361_v45, %v1362_v44  ;;  %v201_v58 = vsel %vm189_vm10, %v1362_v44, %v1327_v50  ;;  %v1342_v24 = vunpack.i.h.bf16 %v1707_v39  ;;  %v781_v50 = vld [vmem:[%s2031_s3 + $0x20] sm:$0xff] }
 0x107   :  { %v1375_v40 = vpop.permute.xlu1 %1374 }
 0x108   :  { %v1377_v62 = vunpack.i.h.bf16 %v1375_v40  ;;  %v1376_v63 = vunpack.i.l.bf16 %v1375_v40 }
 0x109   :  { %v1350_v41 = vpop.permute.xlu0 %1349 }
 0x10a   :  { %v1352_v42 = vunpack.i.h.bf16 %v1350_v41  ;;  %v1351_v43 = vunpack.i.l.bf16 %v1350_v41  ;;  %v206_v13 = vsel %vm189_vm10, %v1376_v63, %v1377_v62  ;;  %v207_v18 = vsel %vm189_vm10, %v1377_v62, %v1337_v5 }
 0x10b   :  { %v1385_v52 = vpop.permute.xlu1 %1384  ;;  %v205_v23 = vsel %vm189_vm10, %v1332_v7, %v1376_v63 }
 0x10c   :  { %v190_v46 = vsel %vm189_vm10, %v1351_v43, %v1316_v25  ;;  %v193_v47 = vsel %vm189_vm10, %v1352_v42, %v1346_v30  ;;  %v1387_v14 = vunpack.i.h.bf16 %v1385_v52  ;;  %v1386_v15 = vunpack.i.l.bf16 %v1385_v52 }
 0x10d   :  { %v1355_v48 = vpop.permute.xlu0 %1354  ;;  %v1126_v49 = vpack.c.bf16 %v193_v47, %v190_v46  ;;  %v1341_v30 = vunpack.i.l.bf16 %v1707_v39 }
 0x10e   :  { %v1357_v53 = vunpack.i.h.bf16 %v1355_v48  ;;  %v1356_v54 = vunpack.i.l.bf16 %v1355_v48  ;;  %v212_v34 = vsel %vm189_vm10, %v1386_v15, %v1387_v14  ;;  %v211_v36 = vsel %vm189_vm10, %v1342_v24, %v1386_v15 }
 0x10f   :  { %1127 = vmatpush1.bf16.msra.mxu0 %v1126_v49  ;;  %v1390_v2 = vpop.permute.xlu1 %1389 }
 0x110   :  { %v197_v55 = vsel %vm189_vm10, %v1356_v54, %v1357_v53  ;;  %v198_v57 = vsel %vm189_vm10, %v1357_v53, %v1326_v51  ;;  %v1392_v16 = vunpack.i.h.bf16 %v1390_v2  ;;  %v1391_v31 = vunpack.i.l.bf16 %v1390_v2 }
 0x111   :  { %v1365_v59 = vpop.permute.xlu0 %1364  ;;  %v1128_v60 = vpack.c.bf16 %v200_v56, %v197_v55  ;;  %v1150_v61 = vpack.c.bf16 %v201_v58, %v198_v57  ;;  %v113_v56 = vld [vmem:[%s2029_s1] sm:$0xff]  ;;  %v396_v57 = vlaneseq }
 0x112   :  { %v1367_v0 = vunpack.i.h.bf16 %v1365_v59  ;;  %v1366_v1 = vunpack.i.l.bf16 %v1365_v59  ;;  %v213_v35 = vsel %vm189_vm10, %v1387_v14, %v1392_v16 }
 0x113   :  { %1129 = vmatprep.subr.bf16.mxu0 %v1128_v60  ;;  %1151 = vmatpush3.bf16.msra.mxu1 %v1150_v61  ;;  %v1395_v28 = vpop.permute.xlu1 %1394  ;;  %v397_v58 = vshrl.u32 %v396_v57, 7  ;;  %v23_v60 = vld [vmem:[%s2030_s5] sm:$0x7] }
 0x114   :  { %v196_v3 = vsel %vm189_vm10, %v1366_v1, %v1356_v54  ;;  %v199_v4 = vsel %vm189_vm10, %v1367_v0, %v1361_v45  ;;  %1152 = vmatprep.subr.bf16.mxu1 %v1552_v19  ;;  %v1396_v37 = vunpack.i.l.bf16 %v1395_v28  ;;  %v1738_v47 = vunpack.i.h.bf16 %v1395_v28 }
 0x115   :  { %v1370_v8 = vpop.permute.xlu0 %1369  ;;  %v1130_v9 = vpack.c.bf16 %v199_v4, %v196_v3  ;;  %v398_v59 = vsub.s32 0, %v397_v58  ;;  %v402_v61 = vsub.s32 1, %v397_v58  ;;  %v406_v62 = vsub.s32 2, %v397_v58 }
 0x116   :  { %v1372_v11 = vunpack.i.h.bf16 %v1370_v8  ;;  %v1371_v12 = vunpack.i.l.bf16 %v1370_v8 }
 0x117   :  { %1131 = vmatpush1.bf16.msra.mxu0 %v1130_v9  ;;  %v399_v63 = vrot.slane %v23_v60, %v398_v59  ;;  %v403_v1 = vrot.slane %v23_v60, %v402_v61  ;;  %v407_v2 = vrot.slane %v23_v60, %v406_v62 }
 0x118   :  { %v203_v20 = vsel %vm189_vm10, %v1371_v12, %v1372_v11  ;;  %v204_v21 = vsel %vm189_vm10, %v1372_v11, %v1336_v6  ;;  %v202_v22 = vsel %vm189_vm10, %v1331_v10, %v1371_v12 }
 0x119   :  { %v1380_v25 = vpop.permute.xlu0 %1379  ;;  %v1132_v26 = vpack.c.bf16 %v206_v13, %v203_v20  ;;  %v1153_v27 = vpack.c.bf16 %v207_v18, %v204_v21  ;;  %v1134_v29 = vpack.c.bf16 %v205_v23, %v202_v22  ;;  %v422_v13 = vld [vmem:[#allocation2] sm:$0xff] }
 0x11a   :  { %v1382_v32 = vunpack.i.h.bf16 %v1380_v25  ;;  %v1381_v33 = vunpack.i.l.bf16 %v1380_v25 }
 0x11b   :  { %1133 = vmatprep.subr.bf16.mxu0 %v1132_v26  ;;  %1154 = vmatpush3.bf16.msra.mxu1 %v1153_v27 }
 0x11c   :  { %1135 = vmatpush1.bf16.msra.mxu0 %v1134_v29  ;;  %1155 = vmatprep.subr.bf16.mxu1 %v1552_v19  ;;  %v209_v38 = vsel %vm189_vm10, %v1381_v33, %v1382_v32  ;;  %v210_v39 = vsel %vm189_vm10, %v1382_v32, %v1391_v31  ;;  %v208_v40 = vsel %vm189_vm10, %v1341_v30, %v1381_v33 }
 0x11d   :  { %v1400_v41 = vpop.permute.xlu0 %1399  ;;  %v1136_v42 = vpack.c.bf16 %v212_v34, %v209_v38  ;;  %v1156_v43 = vpack.c.bf16 %v213_v35, %v210_v39  ;;  %v1138_v44 = vpack.c.bf16 %v211_v36, %v208_v40 }
 0x11e   :  { %v1402_v45 = vunpack.i.h.bf16 %v1400_v41  ;;  %v1401_v46 = vunpack.i.l.bf16 %v1400_v41 }
 0x11f   :  { %1137 = vmatprep.subr.bf16.mxu0 %v1136_v42  ;;  %1157 = vmatpush3.bf16.msra.mxu1 %v1156_v43 }
 0x120   :  { %v214_v48 = vsel %vm189_vm10, %v1396_v37, %v1401_v46  ;;  %v215_v49 = vsel %vm189_vm10, %v1401_v46, %v1402_v45  ;;  %1139 = vmatpush1.bf16.msra.mxu0 %v1138_v44  ;;  %1158 = vmatprep.subr.bf16.mxu1 %v1552_v19 }
 0x121   :  { %v1140_v51 = vpack.c.bf16 %v1738_v47, %v215_v49  ;;  %v1143_v52 = vpack.c.bf16 %v1738_v47, %v214_v48  ;;  %v186_v53 = vpop.permute.xlu0 %185 }
 0x122   :  { %v216_v54 = vsel %vm189_vm10, %v1402_v45, %v186_v53 }
 0x123   :  { %v1159_v55 = vpack.c.bf16 %v1738_v47, %v216_v54  ;;  %1142 = vmatprep.subr.msk.bf16.mxu0 %vm1743_vm13, %v1140_v51 }
 0x124   :  { %1145 = vmatpush1.bf16.msk.msra.mxu0 %vm1743_vm13, %v1143_v52 }
 0x125   :  { %1161 = vmatpush3.bf16.msk.msra.mxu1 %vm1743_vm13, %v1159_v55 }
 0x126   :  { %1184 = vmatprep.subr.bf16.mxu1 %v1552_v19 }
 0x127   :  { %979 = vmatmul.mubr.msk.f32.vlgmr.msra.gmra.mrb[0].mxu0 %vm244_vm14, %v113_v56 }
 0x128   :  { %1078 = vmatmul.mubr.msk.f32.vlgmr.msra.gmra.mrb[0].mxu1 %vm244_vm14, %v113_v56  ;;  %697 = vmatprep.mubr.f32.mxu0 %v1554_v17 }
 0x129   :  { %1100 = vmatprep.mubr.msk.f32.mxu1 %vm1555_vm9, %v1554_v17 }
 0x1fa   :  { %v317_v0 = vpop.f32.mrb[0].mxu0 }
 0x1fb   :  { %v392_v3 = vmax.f32 %v317_v0, 0.0  ;;  %v319_v4 = vpop.f32.mrb[1].mxu0  ;;  %v388_v5 = vpop.f32.mrb[0].mxu1 }
 0x1fc   :  { %v393_v6 = vmax.f32 %v319_v4, 0.0  ;;  %v394_v7 = vmax.f32 %v388_v5, 0.0  ;;  %v1079_v8 = vpop.f32.mrb[1].mxu1 }
 0x1fd   :  { %v411_v9 = vmul.f32 %v399_v63, %v392_v3 }
 0x1fe   :  { %v412_v10 = vmul.f32 %v403_v1, %v393_v6  ;;  %v413_v11 = vmul.f32 %v407_v2, %v394_v7 }
 0x200   :  { %421 = vst.msk [vmem:[#allocation2 + $0x18] sm:$0xff] %vm420_vm8, %v413_v11  ;;  %v1418_v12 = vpack.i.bf16 %v412_v10, %v411_v9 }
 0x202   :  { %1419 = vrot.lane.b32.xlu1 %v1418_v12, %s1544_s30 }
 0x206   :  { %1424 = vrot.lane.b32.xlu1 %v1418_v12, %s1543_s29 }
 0x207   :  { %v425_v14 = vld [vmem:[#allocation2 + $0x18] sm:$0xff] }
 0x208   :  { %v1403_v15 = vpack.i.bf16 %v422_v13, %v425_v14 }
 0x20a   :  { %1404 = vrot.lane.b32.xlu0 %v1403_v15, %s1544_s30  ;;  %1429 = vrot.lane.b32.xlu1 %v1418_v12, %s1545_s7 }
 0x20e   :  { %1409 = vrot.lane.b32.xlu0 %v1403_v15, %s1543_s29  ;;  %1434 = vrot.lane.b32.xlu1 %v1418_v12, %s1546_s8 }
 0x212   :  { %1414 = vrot.lane.b32.xlu0 %v1403_v15, %s1545_s7  ;;  %1439 = vrot.lane.b32.xlu1 %v1418_v12, %s1547_s0 }
 0x216   :  { %467 = vrot.lane.b32.xlu0 %v425_v14, %s1546_s8  ;;  %1444 = vrot.lane.b32.xlu1 %v1418_v12, %s1548_s9 }
 0x21a   :  { %475 = vrot.lane.b32.xlu0 %v425_v14, %s1547_s0  ;;  %1449 = vrot.lane.b32.xlu1 %v1418_v12, %s1549_s10 }
 0x21e   :  { %483 = vrot.lane.b32.xlu0 %v425_v14, %s1548_s9  ;;  %1454 = vrot.lane.b32.xlu1 %v1418_v12, %s1550_s11 }
 0x222   :  { %491 = vrot.lane.b32.xlu0 %v425_v14, %s1549_s10  ;;  %1459 = vrot.lane.b32.xlu1 %v1418_v12, %s1551_s12 }
 0x226   :  { %499 = vrot.lane.b32.xlu0 %v425_v14, %s1550_s11 }
 0x274   :  { %v1420_v16 = vpop.permute.xlu1 %1419 }
 0x275   :  { %v1421_v33 = vunpack.i.l.bf16 %v1420_v16  ;;  %v1422_v60 = vunpack.i.h.bf16 %v1420_v16 }
 0x277   :  { %v439_v7 = vsel %vm40_vm0, %v1421_v33, %v1422_v60 }
 0x278   :  { %v1789_v18 = vpop.permute.xlu1 %1424 }
 0x279   :  { %v1426_v55 = vunpack.i.l.bf16 %v1789_v18  ;;  %v1427_v5 = vunpack.i.h.bf16 %v1789_v18 }
 0x27b   :  { %v450_v12 = vsel %vm52_vm4, %v1426_v55, %v1427_v5 }
 0x27c   :  { %v1405_v20 = vpop.permute.xlu0 %1404  ;;  %v1430_v21 = vpop.permute.xlu1 %1429 }
 0x27d   :  { %v1406_v22 = vunpack.i.l.bf16 %v1405_v20  ;;  %v1407_v26 = vunpack.i.h.bf16 %v1405_v20  ;;  %v1432_v39 = vunpack.i.h.bf16 %v1430_v21  ;;  %v1431_v40 = vunpack.i.l.bf16 %v1430_v21 }
 0x27f   :  { %v1463_v23 = vpack.i.bf16 %v1406_v22, %v425_v14  ;;  %v438_v37 = vsel %vm40_vm0, %v1407_v26, %v1421_v33  ;;  %v461_v52 = vsel %vm64_vm1, %v1431_v40, %v1432_v39  ;;  %v440_v2 = vsel %vm40_vm0, %v1422_v60, %v1406_v22 }
 0x280   :  { %v1410_v24 = vpop.permute.xlu0 %1409  ;;  %v1791_v25 = vpop.permute.xlu1 %1434  ;;  %v1483_v41 = vpack.i.bf16 %v438_v37, %v422_v13  ;;  %v1493_v8 = vpack.i.bf16 %v440_v2, %v439_v7  ;;  %vm828_vm0 = vcmask 1043456  }
 0x281   :  { %1464 = vrot.lane.b32.xlu1 %v1463_v23, %s1551_s12  ;;  %v1411_v29 = vunpack.i.l.bf16 %v1410_v24  ;;  %v1436_v31 = vunpack.i.l.bf16 %v1791_v25  ;;  %v1412_v49 = vunpack.i.h.bf16 %v1410_v24  ;;  %v1437_v11 = vunpack.i.h.bf16 %v1791_v25 }
 0x283   :  { %v449_v62 = vsel %vm52_vm4, %v1412_v49, %v1426_v55  ;;  %v451_v10 = vsel %vm52_vm4, %v1427_v5, %v1411_v29  ;;  %v469_v18 = vsel %vm74_vm5, %v1436_v31, %v1437_v11 }
 0x284   :  { %v1415_v27 = vpop.permute.xlu0 %1414  ;;  %v1440_v28 = vpop.permute.xlu1 %1439  ;;  %v1498_v15 = vpack.i.bf16 %v451_v10, %v450_v12 }
 0x285   :  { %v1416_v30 = vunpack.i.l.bf16 %v1415_v27  ;;  %v1441_v32 = vunpack.i.l.bf16 %v1440_v28  ;;  %v1417_v42 = vunpack.i.h.bf16 %v1415_v27  ;;  %v1442_v51 = vunpack.i.h.bf16 %v1440_v28 }
 0x287   :  { %v1468_v34 = vpack.i.bf16 %v1416_v30, %v1411_v29  ;;  %v1473_v35 = vpack.i.bf16 %v1441_v32, %v1436_v31  ;;  %v462_v44 = vsel %vm64_vm1, %v1432_v39, %v1416_v30  ;;  %v460_v58 = vsel %vm64_vm1, %v1417_v42, %v1431_v40 }
 0x288   :  { %v468_v36 = vpop.permute.xlu0 %467  ;;  %v1445_v38 = vpop.permute.xlu1 %1444  ;;  %v1503_v53 = vpack.i.bf16 %v462_v44, %v461_v52  ;;  %v477_v61 = vsel %vm83_vm2, %v1441_v32, %v1442_v51  ;;  %v1488_v0 = vpack.i.bf16 %v460_v58, %v449_v62 }
 0x289   :  { %1469 = vrot.lane.b32.xlu1 %v1468_v34, %s1551_s12  ;;  %1474 = vrot.lane.b32.xlu0 %v1473_v35, %s1551_s12  ;;  %v1446_v46 = vunpack.i.l.bf16 %v1445_v38  ;;  %v470_v16 = vsel %vm74_vm5, %v1437_v11, %v468_v36  ;;  %v1447_v20 = vunpack.i.h.bf16 %v1445_v38 }
 0x28a   :  { %v1508_v21 = vpack.i.bf16 %v470_v16, %v469_v18 }
 0x28b   :  { %v485_v25 = vsel %vm92_vm6, %v1446_v46, %v1447_v20 }
 0x28c   :  { %v476_v43 = vpop.permute.xlu0 %475  ;;  %v1450_v45 = vpop.permute.xlu1 %1449 }
 0x28d   :  { %1484 = vrot.lane.b32.xlu1 %v1483_v41, %s1551_s12  ;;  %v1451_v48 = vunpack.i.l.bf16 %v1450_v45  ;;  %v478_v56 = vsel %vm83_vm2, %v1442_v51, %v476_v43  ;;  %v1452_v59 = vunpack.i.h.bf16 %v1450_v45  ;;  %v1528_v13 = vpack.i.bf16 %v476_v43, %v468_v36 }
 0x28e   :  { %v1513_v63 = vpack.i.bf16 %v478_v56, %v477_v61 }
 0x28f   :  { %v1478_v54 = vpack.i.bf16 %v1451_v48, %v1446_v46  ;;  %v493_v3 = vsel %vm101_vm3, %v1451_v48, %v1452_v59 }
 0x290   :  { %v484_v57 = vpop.permute.xlu0 %483  ;;  %v1455_v9 = vpop.permute.xlu1 %1454 }
 0x291   :  { %1504 = vrot.lane.b32.xlu1 %v1503_v53, %s1551_s12  ;;  %1479 = vrot.lane.b32.xlu0 %v1478_v54, %s1551_s12  ;;  %v1456_v14 = vunpack.i.l.bf16 %v1455_v9  ;;  %v486_v23 = vsel %vm92_vm6, %v1447_v20, %v484_v57  ;;  %v1457_v26 = vunpack.i.h.bf16 %v1455_v9 }
 0x292   :  { %v1518_v27 = vpack.i.bf16 %v486_v23, %v485_v25 }
 0x293   :  { %v1533_v22 = vpack.i.bf16 %v484_v57, %v1456_v14  ;;  %v501_v29 = vsel %vm110_vm7, %v1456_v14, %v1457_v26 }
 0x294   :  { %v492_v1 = vpop.permute.xlu0 %491  ;;  %v1460_v31 = vpop.permute.xlu1 %1459 }
 0x295   :  { %v494_v4 = vsel %vm101_vm3, %v1452_v59, %v492_v1  ;;  %1514 = vrot.lane.b32.xlu1 %v1513_v63, %s1551_s12  ;;  %1489 = vrot.lane.b32.xlu0 %v1488_v0, %s1551_s12  ;;  %v1462_v38 = vunpack.i.h.bf16 %v1460_v31  ;;  %v1461_v39 = vunpack.i.l.bf16 %v1460_v31 }
 0x296   :  { %v1523_v6 = vpack.i.bf16 %v494_v4, %v493_v3 }
 0x297   :  { %v577_v46 = vsel %vm189_vm10, %v1461_v39, %v1462_v38 }
 0x298   :  { %v500_v24 = vpop.permute.xlu0 %499 }
 0x299   :  { %1524 = vrot.lane.b32.xlu1 %v1523_v6, %s1551_s12  ;;  %1494 = vrot.lane.b32.xlu0 %v1493_v8, %s1551_s12  ;;  %v502_v28 = vsel %vm110_vm7, %v1457_v26, %v500_v24 }
 0x29a   :  { %v1538_v30 = vpack.i.bf16 %v502_v28, %v501_v29 }
 0x29d   :  { %1529 = vrot.lane.b32.xlu1 %v1528_v13, %s1551_s12  ;;  %1499 = vrot.lane.b32.xlu0 %v1498_v15, %s1551_s12 }
 0x2a1   :  { %1534 = vrot.lane.b32.xlu1 %v1533_v22, %s1551_s12  ;;  %1509 = vrot.lane.b32.xlu0 %v1508_v21, %s1551_s12 }
 0x2a5   :  { %574 = vrot.lane.b32.xlu1 %v500_v24, %s1551_s12  ;;  %1519 = vrot.lane.b32.xlu0 %v1518_v27, %s1551_s12 }
 0x2a9   :  { %1539 = vrot.lane.b32.xlu0 %v1538_v30, %s1551_s12 }
 0x2ad   :  { %566 = vrot.lane.b32.xlu0 %v492_v1, %s1551_s12 }
 0x2f3   :  { %v1465_v32 = vpop.permute.xlu1 %1464 }
 0x2f4   :  { %v1466_v42 = vunpack.i.l.bf16 %v1465_v32  ;;  %v1467_v48 = vunpack.i.h.bf16 %v1465_v32 }
 0x2f6   :  { %v578_v53 = vsel %vm189_vm10, %v1462_v38, %v1466_v42 }
 0x2fb   :  { %v1470_v33 = vpop.permute.xlu1 %1469  ;;  %v1834_v35 = vpop.permute.xlu0 %1474 }
 0x2fc   :  { %v1472_v54 = vunpack.i.h.bf16 %v1470_v33  ;;  %v1471_v3 = vunpack.i.l.bf16 %v1470_v33  ;;  %v1477_v7 = vunpack.i.h.bf16 %v1834_v35  ;;  %v1476_v8 = vunpack.i.l.bf16 %v1834_v35 }
 0x2ff   :  { %v1485_v34 = vpop.permute.xlu1 %1484 }
 0x300   :  { %v1486_v43 = vunpack.i.l.bf16 %v1485_v34  ;;  %v1487_v49 = vunpack.i.h.bf16 %v1485_v34 }
 0x302   :  { %v576_v55 = vsel %vm189_vm10, %v1486_v43, %v1461_v39 }
 0x303   :  { %v1505_v36 = vpop.permute.xlu1 %1504  ;;  %v1836_v37 = vpop.permute.xlu0 %1479 }
 0x304   :  { %v1507_v56 = vunpack.i.h.bf16 %v1505_v36  ;;  %v1506_v57 = vunpack.i.l.bf16 %v1505_v36  ;;  %v1481_v39 = vunpack.i.l.bf16 %v1836_v37  ;;  %v1482_v43 = vunpack.i.h.bf16 %v1836_v37 }
 0x306   :  { %v587_v11 = vsel %vm189_vm10, %v1507_v56, %v1472_v54  ;;  %v586_v21 = vsel %vm189_vm10, %v1506_v57, %v1507_v56 }
 0x307   :  { %v1515_v40 = vpop.permute.xlu1 %1514  ;;  %v1490_v41 = vpop.permute.xlu0 %1489 }
 0x308   :  { %v1492_v61 = vunpack.i.h.bf16 %v1490_v41  ;;  %v1491_v4 = vunpack.i.l.bf16 %v1490_v41  ;;  %v1517_v9 = vunpack.i.h.bf16 %v1515_v40  ;;  %v1516_v10 = vunpack.i.l.bf16 %v1515_v40 }
 0x30a   :  { %v585_v15 = vsel %vm189_vm10, %v1492_v61, %v1506_v57  ;;  %v592_v29 = vsel %vm189_vm10, %v1516_v10, %v1517_v9  ;;  %v591_v34 = vsel %vm189_vm10, %v1477_v7, %v1516_v10  ;;  %v503_v10 = vld [vmem:[%s2032_s2] sm:$0xff] }
 0x30b   :  { %v1838_v44 = vpop.permute.xlu1 %1524  ;;  %v1495_v45 = vpop.permute.xlu0 %1494 }
 0x30c   :  { %v1497_v51 = vunpack.i.h.bf16 %v1495_v45  ;;  %v1496_v52 = vunpack.i.l.bf16 %v1495_v45  ;;  %v1527_v26 = vunpack.i.h.bf16 %v1838_v44  ;;  %v1526_v27 = vunpack.i.l.bf16 %v1838_v44 }
 0x30e   :  { %v579_v58 = vsel %vm189_vm10, %v1487_v49, %v1496_v52  ;;  %v581_v59 = vsel %vm189_vm10, %v1497_v51, %v1467_v48  ;;  %v580_v60 = vsel %vm189_vm10, %v1496_v52, %v1497_v51  ;;  %v598_v48 = vsel %vm189_vm10, %v1526_v27, %v1527_v26 }
 0x30f   :  { %v1530_v62 = vpop.permute.xlu1 %1529  ;;  %v1164_v63 = vpack.c.bf16 %v579_v58, %v576_v55  ;;  %v1185_v0 = vpack.c.bf16 %v581_v59, %v578_v53  ;;  %v1500_v1 = vpop.permute.xlu0 %1499  ;;  %v1162_v2 = vpack.c.bf16 %v580_v60, %v577_v46  ;;  %v597_v49 = vsel %vm189_vm10, %v1482_v43, %v1526_v27  ;;  %v793_v59 = vld [vmem:[%s2031_s3 + $0x80] sm:$0xff]  ;;  %v794_v60 = vld [vmem:[%s2031_s3 + $0x88] sm:$0xff]  ;;  %v799_v27 = vld [vmem:[%s2031_s3 + $0xb0] sm:$0xff] }
 0x310   :  { %v1502_v5 = vunpack.i.h.bf16 %v1500_v1  ;;  %v1501_v6 = vunpack.i.l.bf16 %v1500_v1  ;;  %v1532_v12 = vunpack.i.h.bf16 %v1530_v62  ;;  %v1531_v22 = vunpack.i.l.bf16 %v1530_v62 }
 0x311   :  { %1163 = vmatprep.subr.bf16.mxu0 %v1162_v2  ;;  %1186 = vmatpush3.bf16.msra.mxu1 %v1185_v0 }
 0x312   :  { %v582_v13 = vsel %vm189_vm10, %v1491_v4, %v1501_v6  ;;  %v584_v14 = vsel %vm189_vm10, %v1502_v5, %v1471_v3  ;;  %1165 = vmatpush1.bf16.msra.mxu0 %v1164_v63  ;;  %1187 = vmatprep.subr.bf16.mxu1 %v1552_v19  ;;  %v583_v20 = vsel %vm189_vm10, %v1501_v6, %v1502_v5  ;;  %v777_v5 = vld [vmem:[%s2031_s3] sm:$0xff]  ;;  %v778_v6 = vld [vmem:[%s2031_s3 + $0x8] sm:$0xff] }
 0x313   :  { %v1188_v16 = vpack.c.bf16 %v587_v11, %v584_v14  ;;  %v1510_v18 = vpop.permute.xlu0 %1509  ;;  %v1168_v23 = vpack.c.bf16 %v585_v15, %v582_v13  ;;  %v1166_v28 = vpack.c.bf16 %v586_v21, %v583_v20  ;;  %v593_v30 = vsel %vm189_vm10, %v1517_v9, %v1532_v12  ;;  %v1535_v44 = vpop.permute.xlu1 %1534  ;;  %v796_v9 = vld [vmem:[%s2031_s3 + $0x98] sm:$0xff]  ;;  %v809_v12 = vld [vmem:[%s2031_s3 + $0x100] sm:$0xff]  ;;  %v810_v13 = vld [vmem:[%s2031_s3 + $0x108] sm:$0xff] }
 0x314   :  { %v1512_v24 = vunpack.i.h.bf16 %v1510_v18  ;;  %v1511_v25 = vunpack.i.l.bf16 %v1510_v18  ;;  %v1536_v53 = vunpack.i.l.bf16 %v1535_v44  ;;  %v1537_v56 = vunpack.i.h.bf16 %v1535_v44  ;;  %v780_v18 = vld [vmem:[%s2031_s3 + $0x18] sm:$0xff]  ;;  %v797_v20 = vld [vmem:[%s2031_s3 + $0xa0] sm:$0xff]  ;;  %v798_v21 = vld [vmem:[%s2031_s3 + $0xa8] sm:$0xff] }
 0x315   :  { %1189 = vmatpush3.bf16.msra.mxu1 %v1188_v16  ;;  %1167 = vmatprep.subr.bf16.mxu0 %v1166_v28  ;;  %v1200_v4 = vpack.c.bf16 %v794_v60, %v793_v59  ;;  %v1202_v11 = vpack.c.bf16 %v778_v6, %v777_v5  ;;  %v779_v16 = vld [vmem:[%s2031_s3 + $0x10] sm:$0xff]  ;;  %v800_v28 = vld [vmem:[%s2031_s3 + $0xb8] sm:$0xff] }
 0x316   :  { %v588_v31 = vsel %vm189_vm10, %v1476_v8, %v1511_v25  ;;  %v590_v32 = vsel %vm189_vm10, %v1512_v24, %v1531_v22  ;;  %1190 = vmatprep.subr.bf16.mxu1 %v1552_v19  ;;  %v589_v33 = vsel %vm189_vm10, %v1511_v25, %v1512_v24  ;;  %1169 = vmatpush1.bf16.msra.mxu0 %v1168_v23  ;;  %v795_v8 = vld [vmem:[%s2031_s3 + $0x90] sm:$0xff]  ;;  %v812_v24 = vld [vmem:[%s2031_s3 + $0x118] sm:$0xff] }
 0x317   :  { %v1191_v35 = vpack.c.bf16 %v593_v30, %v590_v32  ;;  %v1520_v36 = vpop.permute.xlu0 %1519  ;;  %v1170_v38 = vpack.c.bf16 %v592_v29, %v589_v33  ;;  %v1172_v40 = vpack.c.bf16 %v591_v34, %v588_v31  ;;  %v575_v2 = vpop.permute.xlu1 %574  ;;  %v1204_v15 = vpack.c.bf16 %v796_v9, %v795_v8  ;;  %v811_v23 = vld [vmem:[%s2031_s3 + $0x110] sm:$0xff]  ;;  %v784_v33 = vld [vmem:[%s2031_s3 + $0x38] sm:$0xff]  ;;  %v801_v34 = vld [vmem:[%s2031_s3 + $0xc0] sm:$0xff] }
 0x318   :  { %v1522_v41 = vunpack.i.h.bf16 %v1520_v36  ;;  %v1521_v42 = vunpack.i.l.bf16 %v1520_v36  ;;  %v1206_v22 = vpack.c.bf16 %v780_v18, %v779_v16  ;;  %v1208_v25 = vpack.c.bf16 %v798_v21, %v797_v20  ;;  %v783_v32 = vld [vmem:[%s2031_s3 + $0x30] sm:$0xff]  ;;  %v808_v59 = vld [vmem:[%s2031_s3 + $0xf8] sm:$0xff] }
 0x319   :  { %1171 = vmatprep.subr.bf16.mxu0 %v1170_v38  ;;  %1192 = vmatpush3.bf16.msra.mxu1 %v1191_v35  ;;  %v1236_v29 = vpack.c.bf16 %v812_v24, %v811_v23  ;;  %v1212_v31 = vpack.c.bf16 %v800_v28, %v799_v27  ;;  %v802_v35 = vld [vmem:[%s2031_s3 + $0xc8] sm:$0xff]  ;;  %v1214_v36 = vpack.c.bf16 %v784_v33, %v783_v32 }
 0x31a   :  { %v594_v45 = vsel %vm189_vm10, %v1481_v39, %v1521_v42  ;;  %v595_v46 = vsel %vm189_vm10, %v1521_v42, %v1522_v41  ;;  %1193 = vmatprep.subr.bf16.mxu1 %v1552_v19  ;;  %1173 = vmatpush1.bf16.msra.mxu0 %v1172_v40  ;;  %v596_v0 = vsel %vm189_vm10, %v1522_v41, %v1537_v56  ;;  %v785_v39 = vld [vmem:[%s2031_s3 + $0x40] sm:$0xff]  ;;  %v786_v40 = vld [vmem:[%s2031_s3 + $0x48] sm:$0xff]  ;;  %v803_v41 = vld [vmem:[%s2031_s3 + $0xd0] sm:$0xff] }
 0x31b   :  { %v1540_v51 = vpop.permute.xlu0 %1539  ;;  %v1174_v52 = vpack.c.bf16 %v598_v48, %v595_v46  ;;  %v1176_v54 = vpack.c.bf16 %v597_v49, %v594_v45  ;;  %v1216_v38 = vpack.c.bf16 %v802_v35, %v801_v34  ;;  %v804_v42 = vld [vmem:[%s2031_s3 + $0xd8] sm:$0xff]  ;;  %v1218_v43 = vpack.c.bf16 %v786_v40, %v785_v39  ;;  %v787_v45 = vld [vmem:[%s2031_s3 + $0x50] sm:$0xff]  ;;  %v805_v48 = vld [vmem:[%s2031_s3 + $0xe0] sm:$0xff] }
 0x31c   :  { %v1542_v55 = vunpack.i.h.bf16 %v1540_v51  ;;  %v1541_v37 = vunpack.i.l.bf16 %v1540_v51  ;;  %v1220_v44 = vpack.c.bf16 %v804_v42, %v803_v41  ;;  %v788_v46 = vld [vmem:[%s2031_s3 + $0x58] sm:$0xff]  ;;  %v806_v49 = vld [vmem:[%s2031_s3 + $0xe8] sm:$0xff] }
 0x31d   :  { %1175 = vmatprep.subr.bf16.mxu0 %v1174_v52  ;;  %v1222_v51 = vpack.c.bf16 %v788_v46, %v787_v45  ;;  %v1224_v52 = vpack.c.bf16 %v806_v49, %v805_v48  ;;  %v814_v56 = vld [vmem:[%s2031_s3 + $0x128] sm:$0xff] }
 0x31e   :  { %v600_v57 = vsel %vm189_vm10, %v1536_v53, %v1541_v37  ;;  %v601_v58 = vsel %vm189_vm10, %v1541_v37, %v1542_v55  ;;  %1177 = vmatpush1.bf16.msra.mxu0 %v1176_v54  ;;  %v602_v7 = vsel %vm189_vm10, %v1542_v55, %v575_v2  ;;  %v789_v53 = vld [vmem:[%s2031_s3 + $0x60] sm:$0xff]  ;;  %v790_v54 = vld [vmem:[%s2031_s3 + $0x68] sm:$0xff] }
 0x31f   :  { %v1178_v61 = vpack.c.bf16 %v1738_v47, %v601_v58  ;;  %v567_v62 = vpop.permute.xlu0 %566  ;;  %v1181_v63 = vpack.c.bf16 %v1738_v47, %v600_v57  ;;  %v1197_v14 = vpack.c.bf16 %v1738_v47, %v602_v7  ;;  %v1233_v47 = vpack.c.bf16 %v810_v13, %v809_v12  ;;  %v813_v37 = vld [vmem:[%s2031_s3 + $0x120] sm:$0xff]  ;;  %v807_v58 = vld [vmem:[%s2031_s3 + $0xf0] sm:$0xff] }
 0x320   :  { %v599_v1 = vsel %vm189_vm10, %v1527_v26, %v567_v62  ;;  %v782_v26 = vld [vmem:[%s2031_s3 + $0x28] sm:$0xff]  ;;  %v1226_v55 = vpack.c.bf16 %v790_v54, %v789_v53  ;;  %v1239_v57 = vpack.c.bf16 %v814_v56, %v813_v37  ;;  %v1228_v60 = vpack.c.bf16 %v808_v59, %v807_v58  ;;  %v792_v62 = vld [vmem:[%s2031_s3 + $0x78] sm:$0xff] }
 0x321   :  { %v1194_v3 = vpack.c.bf16 %v599_v1, %v596_v0  ;;  %1180 = vmatprep.subr.msk.bf16.mxu0 %vm1743_vm13, %v1178_v61  ;;  %v1210_v30 = vpack.c.bf16 %v782_v26, %v781_v50  ;;  %v791_v61 = vld [vmem:[%s2031_s3 + $0x70] sm:$0xff]  ;;  %v816_v1 = vld [vmem:[%s2031_s3 + $0x138] sm:$0xff] }
 0x322   :  { %1183 = vmatpush1.bf16.msk.msra.mxu0 %vm1743_vm13, %v1181_v63  ;;  %v1230_v63 = vpack.c.bf16 %v792_v62, %v791_v61  ;;  %v815_v0 = vld [vmem:[%s2031_s3 + $0x130] sm:$0xff] }
 0x323   :  { %1195 = vmatpush3.bf16.msra.mxu1 %v1194_v3  ;;  %1201 = vmatprep.subr.bf16.mxu0 %v1200_v4  ;;  %v1242_v2 = vpack.c.bf16 %v816_v1, %v815_v0  ;;  %v817_v3 = vld [vmem:[%s2031_s3 + $0x140] sm:$0xf] }
 0x324   :  { %1196 = vmatprep.subr.bf16.mxu1 %v1552_v19 }
 0x325   :  { %984 = vmatmul.mubr.msk.f32.vlgmr.msra.gmra.mrb[2].mxu0 %vm244_vm14, %v503_v10 }
 0x326   :  { %1203 = vmatpush3.bf16.msra.mxu0 %v1202_v11 }
 0x327   :  { %1199 = vmatpush3.bf16.msk.msra.mxu1 %vm1743_vm13, %v1197_v14  ;;  %1205 = vmatprep.subr.bf16.mxu0 %v1204_v15 }
 0x328   :  { %1232 = vmatprep.subr.bf16.mxu1 %v1552_v19 }
 0x32a   :  { %1101 = vmatmul.mubr.msk.f32.vlgmr.msra.gmra.mrb[2].mxu1 %vm244_vm14, %v503_v10  ;;  %1207 = vmatpush3.bf16.msra.mxu0 %v1206_v22 }
 0x32b   :  { %1234 = vmatpush3.bf16.msra.mxu1 %v1233_v47  ;;  %1121 = vmatprep.mubr.msk.f32.mxu1 %vm1555_vm9, %v1554_v17 }
 0x32c   :  { %1235 = vmatprep.subr.bf16.mxu1 %v1552_v19  ;;  %1209 = vmatprep.subr.bf16.mxu0 %v1208_v25 }
 0x32e   :  { %1211 = vmatpush3.bf16.msra.mxu0 %v1210_v30 }
 0x32f   :  { %1237 = vmatpush3.bf16.msra.mxu1 %v1236_v29  ;;  %1213 = vmatprep.subr.bf16.mxu0 %v1212_v31 }
 0x330   :  { %1238 = vmatprep.subr.bf16.mxu1 %v1552_v19 }
 0x332   :  { %1215 = vmatpush3.bf16.msra.mxu0 %v1214_v36 }
 0x333   :  { %1217 = vmatprep.subr.bf16.mxu0 %v1216_v38  ;;  %1240 = vmatpush3.bf16.msra.mxu1 %v1239_v57 }
 0x334   :  { %1241 = vmatprep.subr.bf16.mxu1 %v1552_v19 }
 0x336   :  { %1219 = vmatpush3.bf16.msra.mxu0 %v1218_v43 }
 0x337   :  { %1221 = vmatprep.subr.bf16.mxu0 %v1220_v44  ;;  %1243 = vmatpush3.bf16.msra.mxu1 %v1242_v2 }
 0x338   :  { %1119 = vmatprep.subr.mxu1 %v1554_v17  ;;  %v987_v17 = vld [vmem:[%s2033_s4] ss:$0 sm:$0xff] }
 0x33a   :  { %1223 = vmatpush3.bf16.msra.mxu0 %v1222_v51 }
 0x33b   :  { %1225 = vmatprep.subr.bf16.mxu0 %v1224_v52  ;;  %1120 = vmatpush3.msk.msra.mxu1 %vm828_vm0, %v817_v3 }
 0x33e   :  { %1227 = vmatpush3.bf16.msra.mxu0 %v1226_v55 }
 0x33f   :  { %1229 = vmatprep.subr.bf16.mxu0 %v1228_v60 }
 0x342   :  { %1231 = vmatpush3.bf16.msra.mxu0 %v1230_v63 }
 0x3f8   :  { %v699_v19 = vpop.f32.mrb[2].mxu0 }
 0x3f9   :  { %v701_v4 = vpop.f32.mrb[3].mxu0  ;;  %v774_v6 = vmax.f32 %v699_v19, 0.0 }
 0x3fa   :  { %v775_v5 = vmax.f32 %v701_v4, 0.0 }
 0x3fc   :  { %896 = vmatprep.mubr.f32.mxu0 %v775_v5 }
 0x3fd   :  { %v770_v7 = vpop.f32.mrb[2].mxu1  ;;  %897 = vmatmul.mubr.f32.vlgmr.msra.gmra.mrb[4].mxu0 %v774_v6 }
 0x3fe   :  { %v776_v8 = vmax.f32 %v770_v7, 0.0  ;;  %v1102_v9 = vpop.f32.mrb[3].mxu1 }
 0x400   :  { %1122 = vmatmul.mubr.msk.f32.vlgmr.msra.gmra.mrb[4].mxu1 %vm420_vm8, %v776_v8 }
 0x4d0   :  { %v1044_v10 = vpop.f32.mrb[4].mxu0 }
 0x4d1   :  { %v1045_v11 = vpop.f32.mrb[5].mxu0 }
 0x4d2   :  { %v1046_v13 = vadd.f32 %v1045_v11, %v1044_v10 }
 0x4d3   :  { %v968_v12 = vpop.f32.mrb[4].mxu1 }
 0x4d4   :  { %v1123_v14 = vpop.f32.mrb[5].mxu1  ;;  %v899_v15 = vadd.f32 %v1046_v13, %v987_v17 }
 0x4d6   :  { %v969_v16 = vadd.f32 %v968_v12, %v899_v15 }
 0x4d8   :  { %972 = vst [vmem:[%s2034_s6] sm:$0xff] %v969_v16 }

</bundles_post_ra>
